<compile_context>
chip_gen: v6e
topology: v6e:2x2x1
jax: 0.10.0
libtpu: 0.0.40
codegen_flags: <defaults>
</compile_context>

<pallas_src>
import jax
import jax.numpy as jnp
from jax import lax
from jax.experimental import pallas as pl
from jax.experimental.pallas import tpu as pltpu

_EPS_NORMALIZE = 1e-12  # F.normalize default eps  ('original' version)
_EPS_COS_SIM = 1e-8     # F.cosine_similarity eps  ('simplified' version)


def _round_up(x, m):
    return ((x + m - 1) // m) * m


def _sublane_multiple(dtype):
    """Packed-sublane row multiple: 8 for f32, 16 for bf16, 32 for int8."""
    return max(8, 32 // jnp.dtype(dtype).itemsize)


def _device_vmem_budget():
    """(row-tile byte budget, vmem_limit cap) for the local TPU generation."""
    try:
        kind = jax.devices()[0].device_kind.lower()
    except Exception:
        kind = ""
    if "v7" in kind:
        # 64 MiB physical VMEM per TensorCore: big tiles, but cap well below.
        return 24 << 20, 56 << 20
    if "v6" in kind:
        # 128 MiB physical, default scoped 32 MiB -> plenty of headroom.
        return 24 << 20, 100 << 20
    # v5e (16 MiB default scoped limit) and unknown chips: stay conservative.
    return 12 << 20, 56 << 20


def _pick_block_rows(batch, feat, dtype, budget_bytes):
    """Row-tile size: 4 inputs, double-buffered, lane-padded, dtype-aware."""
    itemsize = jnp.dtype(dtype).itemsize
    sub = _sublane_multiple(dtype)
    per_row_bytes = 4 * 2 * _round_up(feat, 128) * itemsize
    rows = budget_bytes // max(per_row_bytes, 1)
    rows = max(sub, (rows // sub) * sub)
    if rows >= batch:
        # Whole batch fits in one tile.  Split into >=2 tiles (when the batch
        # is big enough) so the "parallel" axis can shard across both v7x
        # TensorCores; the extra ~0.35us grid step is negligible on v5e/v6e.
        if batch > sub:
            return min(batch, _round_up(pl.cdiv(batch, 2), sub))
        return batch
    return rows


def _make_simsiam_kernel(version, batch, block_rows, needs_mask):
    """Kernel for one row tile: writes the tile's summed cosine similarities."""

    def cos_sum(p_ref, z_ref, valid):
        p = p_ref[...].astype(jnp.float32)
        z = z_ref[...].astype(jnp.float32)
        dot = jnp.sum(p * z, axis=-1, keepdims=True)           # (bb, 1)
        pn = jnp.sqrt(jnp.sum(p * p, axis=-1, keepdims=True))  # (bb, 1)
        zn = jnp.sqrt(jnp.sum(z * z, axis=-1, keepdims=True))  # (bb, 1)
        if version == "original":
            denom = (jnp.maximum(pn, _EPS_NORMALIZE)
                     * jnp.maximum(zn, _EPS_NORMALIZE))
        else:  # 'simplified' (module default)
            denom = jnp.maximum(pn * zn, _EPS_COS_SIM)
        cos = dot / denom
        if valid is not None:
            cos = jnp.where(valid, cos, 0.0)
        return jnp.sum(cos)

    def kernel(p1_ref, z2_ref, p2_ref, z1_ref, out_ref):
        def tile_sum(valid):
            # 0.5 * criterion(p1, z2) + 0.5 * criterion(p2, z1); sign and
            # scale are applied once in the wrapper on the partial sums.
            return cos_sum(p1_ref, z2_ref, valid) + cos_sum(p2_ref, z1_ref, valid)

        if not needs_mask:
            # Batch divides evenly into tiles: no iota/compare/select at all.
            out_ref[0, 0] = tile_sum(None)
        else:
            i = pl.program_id(0)
            last = pl.num_programs(0) - 1

            @pl.when(i != last)
            def _():
                out_ref[0, 0] = tile_sum(None)

            @pl.when(i == last)
            def _():
                row = (lax.broadcasted_iota(jnp.int32, (block_rows, 1), 0)
                       + i * block_rows)
                out_ref[0, 0] = tile_sum(row < batch)

    return kernel


def simsiam_loss(p1, p2, z1, z2, version="simplified"):
    """Forward pass of SimSiamLoss({'p': (p1, p2), 'z': (z1, z2)})."""
    batch, feat = p1.shape
    budget_bytes, vmem_cap = _device_vmem_budget()
    block_rows = _pick_block_rows(batch, feat, p1.dtype, budget_bytes)
    num_tiles = pl.cdiv(batch, block_rows)
    needs_mask = (batch % block_rows) != 0

    itemsize = jnp.dtype(p1.dtype).itemsize
    footprint = 4 * 2 * block_rows * _round_up(feat, 128) * itemsize
    vmem_limit = int(max(8 << 20, min(vmem_cap, footprint + (4 << 20))))
    # TODO(synk): for extremely wide feature dims whose minimal (sublane-rows)
    # footprint exceeds vmem_cap, add a second 'arbitrary' grid axis tiling
    # the feature dimension with partial-sum accumulators.

    row_spec = pl.BlockSpec((block_rows, feat), lambda i: (i, 0))

    partials = pl.pallas_call(
        _make_simsiam_kernel(version, batch, block_rows, needs_mask),
        out_shape=jax.ShapeDtypeStruct((num_tiles, 1), jnp.float32),
        grid=(num_tiles,),
        in_specs=[row_spec, row_spec, row_spec, row_spec],
        out_specs=pl.BlockSpec(
            (1, 1), lambda i: (i, 0), memory_space=pltpu.MemorySpace.SMEM
        ),
        compiler_params=pltpu.CompilerParams(
            dimension_semantics=("parallel",),
            vmem_limit_bytes=vmem_limit,
        ),
    )(p1, z2, p2, z1)

    # loss = -0.5 * (mean(cos(p1,z2)) + mean(cos(p2,z1)))
    return (-0.5 / batch) * jnp.sum(partials)


def _reference(p1, p2, z1, z2, version="simplified"):
    """Plain-JAX mirror of the PyTorch module, for verification."""

    def criterion(p, z):
        p = p.astype(jnp.float32)
        z = z.astype(jnp.float32)
        if version == "original":
            pn = jnp.maximum(jnp.linalg.norm(p, axis=1, keepdims=True),
                             _EPS_NORMALIZE)
            zn = jnp.maximum(jnp.linalg.norm(z, axis=1, keepdims=True),
                             _EPS_NORMALIZE)
            return -jnp.mean(jnp.sum((p / pn) * (z / zn), axis=1))
        dot = jnp.sum(p * z, axis=-1)
        denom = jnp.maximum(
            jnp.linalg.norm(p, axis=-1) * jnp.linalg.norm(z, axis=-1),
            _EPS_COS_SIM,
        )
        return -jnp.mean(dot / denom)

    return 0.5 * criterion(p1, z2) + 0.5 * criterion(p2, z1)


if __name__ == "__main__":
    key = jax.random.PRNGKey(0)

    # --- f32, small batch (single-tile fast path), both versions -----------
    b, feat = 8, 32
    k1, k2, k3, k4 = jax.random.split(key, 4)
    p1 = jax.random.normal(k1, (b, feat), dtype=jnp.float32)
    p2 = jax.random.normal(k2, (b, feat), dtype=jnp.float32)
    z1 = jax.random.normal(k3, (b, feat), dtype=jnp.float32)
    z2 = jax.random.normal(k4, (b, feat), dtype=jnp.float32)

    loss = jax.block_until_ready(simsiam_loss(p1, p2, z1, z2))
    ref = jax.block_until_ready(_reference(p1, p2, z1, z2))
    assert jnp.allclose(loss, ref, atol=1e-5, rtol=1e-5), (loss, ref)

    loss_o = jax.block_until_ready(simsiam_loss(p1, p2, z1, z2, version="original"))
    ref_o = jax.block_until_ready(_reference(p1, p2, z1, z2, version="original"))
    assert jnp.allclose(loss_o, ref_o, atol=1e-5, rtol=1e-5), (loss_o, ref_o)

    # --- bf16, ragged batch (multi-tile + last-tile mask + 2-TC split) -----
    b2 = 19
    k5, k6, k7, k8 = jax.random.split(jax.random.PRNGKey(1), 4)
    q1 = jax.random.normal(k5, (b2, feat), dtype=jnp.bfloat16)
    q2 = jax.random.normal(k6, (b2, feat), dtype=jnp.bfloat16)
    y1 = jax.random.normal(k7, (b2, feat), dtype=jnp.bfloat16)
    y2 = jax.random.normal(k8, (b2, feat), dtype=jnp.bfloat16)

    loss_b = jax.block_until_ready(simsiam_loss(q1, q2, y1, y2))
    ref_b = jax.block_until_ready(_reference(q1, q2, y1, y2))
    assert jnp.allclose(loss_b, ref_b, atol=2e-5, rtol=2e-5), (loss_b, ref_b)

    print("KERNEL_OK")
</pallas_src>

<mosaic_0001>
module attributes {stable_mosaic.version = 11 : i64} {
  func.func @kernel(%arg0: i32, %arg1: memref<8x32xf32, #tpu.memory_space<vmem>>, %arg2: memref<8x32xf32, #tpu.memory_space<vmem>>, %arg3: memref<8x32xf32, #tpu.memory_space<vmem>>, %arg4: memref<8x32xf32, #tpu.memory_space<vmem>>, %arg5: memref<1x1xf32, #tpu.memory_space<smem>>) attributes {dimension_semantics = [#tpu.dimension_semantics<parallel>], iteration_bounds = array<i64: 1>, scalar_prefetch = 0 : i64, scratch_operands = 0 : i64, tpu.core_type = #tpu.core_type<tc>, window_params = [{transform_indices = @transform_0, window_bounds = array<i64: 8, 32>}, {transform_indices = @transform_1, window_bounds = array<i64: 8, 32>}, {transform_indices = @transform_2, window_bounds = array<i64: 8, 32>}, {transform_indices = @transform_3, window_bounds = array<i64: 8, 32>}, {transform_indices = @transform_4, window_bounds = array<i64: 1, 1>}]} {
    %c0 = arith.constant 0 : index
    %c0_0 = arith.constant 0 : index
    %0 = vector.load %arg1[%c0, %c0_0] : memref<8x32xf32, #tpu.memory_space<vmem>>, vector<8x32xf32>
    %c0_1 = arith.constant 0 : index
    %c0_2 = arith.constant 0 : index
    %1 = vector.load %arg2[%c0_1, %c0_2] : memref<8x32xf32, #tpu.memory_space<vmem>>, vector<8x32xf32>
    %2 = arith.mulf %0, %1 : vector<8x32xf32>
    %cst = arith.constant dense<0.000000e+00> : vector<8xf32>
    %3 = vector.multi_reduction <add>, %2, %cst [1] : vector<8x32xf32> to vector<8xf32>
    %4 = vector.shape_cast %3 : vector<8xf32> to vector<8x1xf32>
    %5 = arith.mulf %0, %0 : vector<8x32xf32>
    %cst_3 = arith.constant dense<0.000000e+00> : vector<8xf32>
    %6 = vector.multi_reduction <add>, %5, %cst_3 [1] : vector<8x32xf32> to vector<8xf32>
    %7 = vector.shape_cast %6 : vector<8xf32> to vector<8x1xf32>
    %8 = math.sqrt %7 : vector<8x1xf32>
    %9 = arith.mulf %1, %1 : vector<8x32xf32>
    %cst_4 = arith.constant dense<0.000000e+00> : vector<8xf32>
    %10 = vector.multi_reduction <add>, %9, %cst_4 [1] : vector<8x32xf32> to vector<8xf32>
    %11 = vector.shape_cast %10 : vector<8xf32> to vector<8x1xf32>
    %12 = math.sqrt %11 : vector<8x1xf32>
    %13 = arith.mulf %8, %12 : vector<8x1xf32>
    %cst_5 = arith.constant 9.99999993E-9 : f32
    %14 = vector.broadcast %cst_5 : f32 to vector<8x1xf32>
    %15 = arith.maximumf %13, %14 : vector<8x1xf32>
    %16 = arith.divf %4, %15 : vector<8x1xf32>
    %17 = vector.shape_cast %16 : vector<8x1xf32> to vector<1x8x1xf32>
    %cst_6 = arith.constant dense<0.000000e+00> : vector<1xf32>
    %18 = vector.multi_reduction <add>, %17, %cst_6 [1, 2] : vector<1x8x1xf32> to vector<1xf32>
    %19 = vector.shape_cast %18 : vector<1xf32> to vector<1x1x1xf32>
    %20 = vector.extract %19[0, 0, 0] : f32 from vector<1x1x1xf32>
    %c0_7 = arith.constant 0 : index
    %c0_8 = arith.constant 0 : index
    %21 = vector.load %arg3[%c0_7, %c0_8] : memref<8x32xf32, #tpu.memory_space<vmem>>, vector<8x32xf32>
    %c0_9 = arith.constant 0 : index
    %c0_10 = arith.constant 0 : index
    %22 = vector.load %arg4[%c0_9, %c0_10] : memref<8x32xf32, #tpu.memory_space<vmem>>, vector<8x32xf32>
    %23 = arith.mulf %21, %22 : vector<8x32xf32>
    %cst_11 = arith.constant dense<0.000000e+00> : vector<8xf32>
    %24 = vector.multi_reduction <add>, %23, %cst_11 [1] : vector<8x32xf32> to vector<8xf32>
    %25 = vector.shape_cast %24 : vector<8xf32> to vector<8x1xf32>
    %26 = arith.mulf %21, %21 : vector<8x32xf32>
    %cst_12 = arith.constant dense<0.000000e+00> : vector<8xf32>
    %27 = vector.multi_reduction <add>, %26, %cst_12 [1] : vector<8x32xf32> to vector<8xf32>
    %28 = vector.shape_cast %27 : vector<8xf32> to vector<8x1xf32>
    %29 = math.sqrt %28 : vector<8x1xf32>
    %30 = arith.mulf %22, %22 : vector<8x32xf32>
    %cst_13 = arith.constant dense<0.000000e+00> : vector<8xf32>
    %31 = vector.multi_reduction <add>, %30, %cst_13 [1] : vector<8x32xf32> to vector<8xf32>
    %32 = vector.shape_cast %31 : vector<8xf32> to vector<8x1xf32>
    %33 = math.sqrt %32 : vector<8x1xf32>
    %34 = arith.mulf %29, %33 : vector<8x1xf32>
    %cst_14 = arith.constant 9.99999993E-9 : f32
    %35 = vector.broadcast %cst_14 : f32 to vector<8x1xf32>
    %36 = arith.maximumf %34, %35 : vector<8x1xf32>
    %37 = arith.divf %25, %36 : vector<8x1xf32>
    %38 = vector.shape_cast %37 : vector<8x1xf32> to vector<1x8x1xf32>
    %cst_15 = arith.constant dense<0.000000e+00> : vector<1xf32>
    %39 = vector.multi_reduction <add>, %38, %cst_15 [1, 2] : vector<1x8x1xf32> to vector<1xf32>
    %40 = vector.shape_cast %39 : vector<1xf32> to vector<1x1x1xf32>
    %41 = vector.extract %40[0, 0, 0] : f32 from vector<1x1x1xf32>
    %42 = arith.addf %20, %41 : f32
    %c0_16 = arith.constant 0 : index
    %c0_17 = arith.constant 0 : index
    %43 = memref.load %arg5[%c0_16, %c0_17] : memref<1x1xf32, #tpu.memory_space<smem>>
    memref.store %42, %arg5[%c0_16, %c0_17] : memref<1x1xf32, #tpu.memory_space<smem>>
    return
  }
  func.func @transform_0(%arg0: i32) -> (i32, i32) {
    %c0_i32 = arith.constant 0 : i32
    %c0_i32_0 = arith.constant 0 : i32
    return %arg0, %c0_i32 : i32, i32
  }
  func.func @transform_1(%arg0: i32) -> (i32, i32) {
    %c0_i32 = arith.constant 0 : i32
    %c0_i32_0 = arith.constant 0 : i32
    return %arg0, %c0_i32 : i32, i32
  }
  func.func @transform_2(%arg0: i32) -> (i32, i32) {
    %c0_i32 = arith.constant 0 : i32
    %c0_i32_0 = arith.constant 0 : i32
    return %arg0, %c0_i32 : i32, i32
  }
  func.func @transform_3(%arg0: i32) -> (i32, i32) {
    %c0_i32 = arith.constant 0 : i32
    %c0_i32_0 = arith.constant 0 : i32
    return %arg0, %c0_i32 : i32, i32
  }
  func.func @transform_4(%arg0: i32) -> (i32, i32) {
    %c0_i32 = arith.constant 0 : i32
    %c0_i32_0 = arith.constant 0 : i32
    return %arg0, %c0_i32 : i32, i32
  }
}

</mosaic_0001>

<bundles_post_ra>
// kernel: tpu_custom_call.1
= control target key start
LH: loop header
LB: loop body
LE: loop exit
PB: predicated region body
PF: predicated region fallthrough
CT: control target
= control target key end

     0   :  { %9 = vsyncpa [#allocation3], 0  ;;  %s339_s0 = inlined_call_operand.hbm [shape: f32[8,32], index: 0, kind: input, shape index: {}]   ;;  %s340_s1 = inlined_call_operand.hbm [shape: f32[8,32], index: 1, kind: input, shape index: {}]   ;;  %s341_s2 = inlined_call_operand.hbm [shape: f32[8,32], index: 2, kind: input, shape index: {}]   ;;  %s342_s3 = inlined_call_operand.hbm [shape: f32[8,32], index: 3, kind: input, shape index: {}]   ;;  %s343_s4 = inlined_call_operand.hbm [shape: f32[1,1], index: 4, kind: output, shape index: {}]  }
   0x1   :  { %10 = vsyncpa [#allocation6], 0 }
   0x2   :  { %11 = vsyncpa [#allocation9], 0 }
   0x3   :  { %12 = vsyncpa [#allocation4], 0  ;;  %s287_s15 = smov [#allocation5]   ;;  %s288_s17 = smov [#allocation2]  }
   0x4   :  { %s29_s16 = sshll.u32 %s287_s15, 4  ;;  %s19_s18 = sshll.u32 %s288_s17, 4  ;;  %s30_s16 = int_to_ptr.vmem [resolvable:$true] %s29_s16  ;;  %s20_s18 = int_to_ptr.vmem [resolvable:$true] %s19_s18 }
   0x5   :  { %s199_s19 = scalar_lea.vmem %s30_s16, 128  ;;  %p204_p1 = scmp.lt.s32.totalorder %s30_s16, %s30_s16 }
   0x6   :  { %p200_p0 = scmp.ne.s32.totalorder %s30_s16, %s199_s19  ;;  %p205_p2 = scmp.lt.s32.totalorder %s199_s19, %s199_s19 }
   0x8   :  { %p206_p3 = por %p205_p2, %p204_p1 }
   0xa   :  { %p207_p4 = pnand %p206_p3, %p200_p0 }
   0xc   :  { %210 = shalt.err (!%p207_p4)
}
   0xd   :  { %32 = dma.hbm_to_vmem [thread:$0]  %s340_s1, 128, %s30_s16, [#allocation6]  }
   0xe   :  { %s219_s22 = scalar_lea.vmem %s20_s18, 128  ;;  %p224_p6 = scmp.lt.s32.totalorder %s20_s18, %s20_s18 }
   0xf   :  { %p220_p5 = scmp.ne.s32.totalorder %s20_s18, %s219_s22  ;;  %p225_p7 = scmp.lt.s32.totalorder %s219_s22, %s219_s22 }
  0x11   :  { %p226_p8 = por %p225_p7, %p224_p6 }
  0x13   :  { %p227_p9 = pnand %p226_p8, %p220_p5 }
  0x15   :  { %230 = shalt.err (!%p227_p9)
}
  0x16   :  { %22 = dma.hbm_to_vmem [thread:$0]  %s339_s0, 128, %s20_s18, [#allocation3]  }
  0x17   :  { %s289_s25 = smov [#allocation7]   ;;  %s290_s27 = smov [#allocation8]  }
  0x18   :  { %s39_s26 = sshll.u32 %s289_s25, 4  ;;  %s49_s28 = sshll.u32 %s290_s27, 4  ;;  %s40_s26 = int_to_ptr.vmem [resolvable:$true] %s39_s26  ;;  %s50_s28 = int_to_ptr.vmem [resolvable:$true] %s49_s28 }
  0x19   :  { %s239_s29 = scalar_lea.vmem %s40_s26, 128  ;;  %p244_p11 = scmp.lt.s32.totalorder %s40_s26, %s40_s26 }
  0x1a   :  { %p240_p10 = scmp.ne.s32.totalorder %s40_s26, %s239_s29  ;;  %p245_p12 = scmp.lt.s32.totalorder %s239_s29, %s239_s29 }
  0x1c   :  { %p246_p13 = por %p245_p12, %p244_p11 }
  0x1e   :  { %p247_p0 = pnand %p246_p13, %p240_p10 }
  0x20   :  { %250 = shalt.err (!%p247_p0)
}
  0x21   :  { %42 = dma.hbm_to_vmem [thread:$0]  %s341_s2, 128, %s40_s26, [#allocation6]  }
  0x22   :  { %s259_s5 = scalar_lea.vmem %s50_s28, 128  ;;  %p264_p2 = scmp.lt.s32.totalorder %s50_s28, %s50_s28 }
  0x23   :  { %p260_p1 = scmp.ne.s32.totalorder %s50_s28, %s259_s5  ;;  %p265_p3 = scmp.lt.s32.totalorder %s259_s5, %s259_s5 }
  0x25   :  { %p266_p4 = por %p265_p3, %p264_p2 }
  0x27   :  { %p267_p5 = pnand %p266_p4, %p260_p1 }
  0x29   :  { %270 = shalt.err (!%p267_p5)
}
  0x2a   :  { %52 = dma.hbm_to_vmem [thread:$0]  %s342_s3, 128, %s50_s28, [#allocation9]  }
  0x2b   :  { %279 = dma.done.wait [#allocation3], 128  }
  0x2c   :  { %280 = vsyncadd [#allocation3], 4294967168 }
  0x2d   :  { %281 = dma.done.wait [#allocation6], 256  }
  0x2e   :  { %282 = vsyncadd [#allocation6], 4294967040 }
  0x2f   :  { %283 = dma.done.wait [#allocation9], 128  }
  0x30   :  { %284 = vsyncadd [#allocation9], 4294967168  ;;  %vm68_vm0 = vcmask 261120   ;;  %v109_v0 = vld [vmem:[#allocation7] sm:$0xff]  ;;  %v65_v1 = vld [vmem:[#allocation2] sm:$0xff]  ;;  %vm98_vm9 = vcmask 7168  }
  0x31   :  { %v110_v2 = vld [vmem:[#allocation8] sm:$0xff]  ;;  %v115_v3 = vmul.f32 %v109_v0, %v109_v0  ;;  %v72_v4 = vmul.f32 %v65_v1, %v65_v1  ;;  %v66_v6 = vld [vmem:[#allocation5] sm:$0xff]  ;;  %s291_s8 = smov [#allocation10]  }
  0x32   :  { %v126_v5 = vmul.f32 %v110_v2, %v110_v2  ;;  %v83_v7 = vmul.f32 %v66_v6, %v66_v6  ;;  %v111_v12 = vmul.f32 %v110_v2, %v109_v0  ;;  %v67_v13 = vmul.f32 %v66_v6, %v65_v1 }
  0x33   :  { %v116_v8 = vsel %vm68_vm0, %v115_v3, 0.0  ;;  %v73_v9 = vsel %vm68_vm0, %v72_v4, 0.0 }
  0x34   :  { %117 = vadd.xlane.f32.xlu1 %v116_v8  ;;  %74 = vadd.xlane.f32.xlu0 %v73_v9  ;;  %v127_v10 = vsel %vm68_vm0, %v126_v5, 0.0  ;;  %v84_v11 = vsel %vm68_vm0, %v83_v7, 0.0  ;;  %v112_v14 = vsel %vm68_vm0, %v111_v12, 0.0  ;;  %v69_v15 = vsel %vm68_vm0, %v67_v13, 0.0 }
  0x38   :  { %128 = vadd.xlane.f32.xlu1 %v127_v10  ;;  %85 = vadd.xlane.f32.xlu0 %v84_v11 }
  0x3c   :  { %113 = vadd.xlane.f32.xlu1 %v112_v14  ;;  %70 = vadd.xlane.f32.xlu0 %v69_v15 }
  0xbd   :  { %v118_v16 = vpop.xlane.xlu1 %117  ;;  %v75_v17 = vpop.xlane.xlu0 %74 }
  0xbe   :  { %179 = vrsqrt.f32 %v118_v16  ;;  %vm121_vm1 = vcmp.eq.f32.partialorder %v118_v16, inf  ;;  %vm123_vm2 = vcmp.eq.f32.partialorder %v118_v16, 0.0  ;;  %v124_v25 = vand.u32 2147483648, %v118_v16 }
  0xbf   :  { %181 = vrsqrt.f32 %v75_v17  ;;  %vm78_vm3 = vcmp.eq.f32.partialorder %v75_v17, inf  ;;  %vm80_vm4 = vcmp.eq.f32.partialorder %v75_v17, 0.0  ;;  %v81_v28 = vand.u32 2147483648, %v75_v17 }
  0xc1   :  { %v129_v18 = vpop.xlane.xlu1 %128  ;;  %v86_v19 = vpop.xlane.xlu0 %85 }
  0xc2   :  { %183 = vrsqrt.f32 %v129_v18  ;;  %vm132_vm5 = vcmp.eq.f32.partialorder %v129_v18, inf  ;;  %v135_v31 = vand.u32 2147483648, %v129_v18  ;;  %vm134_vm6 = vcmp.eq.f32.partialorder %v129_v18, 0.0 }
  0xc3   :  { %185 = vrsqrt.f32 %v86_v19  ;;  %vm89_vm7 = vcmp.eq.f32.partialorder %v86_v19, inf  ;;  %v92_v34 = vand.u32 2147483648, %v86_v19  ;;  %vm91_vm8 = vcmp.eq.f32.partialorder %v86_v19, 0.0 }
  0xc5   :  { %v114_v44 = vpop.xlane.xlu1 %113  ;;  %v71_v45 = vpop.xlane.xlu0 %70 }
  0xcb   :  { %v180_v20 = vpop.eup %179 }
  0xcc   :  { %v182_v21 = vpop.eup %181  ;;  %v120_v22 = vmul.f32 %v180_v20, %v118_v16 }
  0xcd   :  { %v77_v23 = vmul.f32 %v182_v21, %v75_v17 }
  0xce   :  { %v122_v27 = vsel %vm121_vm1, %v118_v16, %v120_v22 }
  0xcf   :  { %v184_v24 = vpop.eup %183  ;;  %v79_v30 = vsel %vm78_vm3, %v75_v17, %v77_v23  ;;  %v125_v35 = vsel %vm123_vm2, %v124_v25, %v122_v27 }
  0xd0   :  { %v186_v26 = vpop.eup %185  ;;  %v131_v29 = vmul.f32 %v184_v24, %v129_v18  ;;  %v82_v38 = vsel %vm80_vm4, %v81_v28, %v79_v30 }
  0xd1   :  { %v88_v32 = vmul.f32 %v186_v26, %v86_v19 }
  0xd2   :  { %v133_v33 = vsel %vm132_vm5, %v129_v18, %v131_v29 }
  0xd3   :  { %v136_v36 = vsel %vm134_vm6, %v135_v31, %v133_v33  ;;  %v90_v37 = vsel %vm89_vm7, %v86_v19, %v88_v32 }
  0xd4   :  { %v137_v39 = vmul.f32 %v136_v36, %v125_v35  ;;  %v93_v40 = vsel %vm91_vm8, %v92_v34, %v90_v37 }
  0xd5   :  { %v94_v41 = vmul.f32 %v93_v40, %v82_v38 }
  0xd6   :  { %v138_v42 = vmax.f32 %v137_v39, 1e-08 }
  0xd7   :  { %v95_v43 = vmax.f32 %v94_v41, 1e-08 }
  0xd8   :  { %187 = vrcp.f32 %v138_v42 }
  0xd9   :  { %189 = vrcp.f32 %v95_v43 }
  0xe5   :  { %v188_v46 = vpop.eup %187 }
  0xe6   :  { %v190_v47 = vpop.eup %189  ;;  %v140_v48 = vmul.f32 %v188_v46, %v114_v44 }
  0xe7   :  { %v97_v49 = vmul.f32 %v190_v47, %v71_v45 }
  0xe8   :  { %v141_v50 = vsel %vm98_vm9, %v140_v48, 0.0 }
  0xe9   :  { %142 = vadd.xlane.f32.xlu1 %v141_v50  ;;  %v99_v51 = vsel %vm98_vm9, %v97_v49, 0.0 }
  0xea   :  { %100 = vadd.xlane.f32.xlu0 %v99_v51 }
 0x172   :  { %v143_v52 = vpop.xlane.xlu1 %142 }
 0x173   :  { %v144_v53 = vrot.slane %v143_v52, 4  ;;  %v101_v54 = vpop.xlane.xlu0 %100 }
 0x174   :  { %v102_v55 = vrot.slane %v101_v54, 4 }
 0x175   :  { %v145_v56 = vadd.f32 %v144_v53, %v143_v52 }
 0x176   :  { %v103_v57 = vadd.f32 %v102_v55, %v101_v54 }
 0x177   :  { %v146_v58 = vrot.slane %v145_v56, 2 }
 0x178   :  { %v104_v59 = vrot.slane %v103_v57, 2 }
 0x179   :  { %v147_v60 = vadd.f32 %v146_v58, %v145_v56 }
 0x17a   :  { %v105_v61 = vadd.f32 %v104_v59, %v103_v57 }
 0x17b   :  { %v148_v62 = vrot.slane %v147_v60, 1 }
 0x17c   :  { %v106_v63 = vrot.slane %v105_v61, 1 }
 0x17d   :  { %v149_v0 = vadd.f32 %v148_v62, %v147_v60 }
 0x17e   :  { %v107_v1 = vadd.f32 %v106_v63, %v105_v61 }
 0x180   :  { %170 = vpush %v107_v1 }
 0x181   :  { %172 = vpush %v149_v0 }
 0x1b1   :  { %s171_s2 = spop %170 }
 0x1b2   :  { %s173_s3 = spop %172 }
 0x1b3   :  { %s151_s7 = sadd.f32 %s173_s3, %s171_s2 }
 0x1b5   :  { %153 = sst [smem:[#allocation10]] %s151_s7 }
 0x1b6   :  { %161 = dma.smem_to_hbm %s291_s8, 16, %s343_s4, [#allocation4]  }
 0x1b7   :  { %285 = dma.done.wait [#allocation4], 16  }
 0x1b8   :  { %286 = vsyncadd [#allocation4], 4294967280 }
 0x1b9   :  { %165 = sfence }
 0x1ba   :  { %166 = vsyncpa [#allocation3], 1 }
 0x1bb   :  { %167 = vsyncpa [#allocation6], 1 }
 0x1bc   :  { %168 = vsyncpa [#allocation9], 1 }
 0x1bd   :  { %169 = vsyncpa [#allocation4], 1 }

</bundles_post_ra>
